<compile_context>
chip_gen: v5e
topology: v5e:2x2
jax: 0.10.0
libtpu: 0.0.40
codegen_flags: <defaults>
</compile_context>

<pallas_src>
import functools

import numpy as np
import jax
import jax.numpy as jnp
from jax.experimental import pallas as pl
from jax.experimental.pallas import tpu as pltpu


def attention_kernel(av0_ref, v_ref, o_ref, *, approx_reciprocal: bool):
    v = v_ref[...]                      # (TB, S, D), native dtype (f32 / bf16)
    av0 = av0_ref[...]                  # (1, D) f32, resident across the grid

    # scores[b, s] = sum_d v[b, s, d] * av0[d]
    # Broadcast multiply promotes v -> f32 per-vreg inside the fused multiply
    # (no explicit full-tile f32 copy kept live); lane reduction on the XLU.
    scores = jnp.sum(v * av0, axis=-1)                       # (TB, S) f32

    # Numerically-stable softmax over the sequence axis.
    m = jnp.max(scores, axis=-1, keepdims=True)
    p = jnp.exp(scores - m)
    denom = jnp.sum(p, axis=-1, keepdims=True)
    if approx_reciprocal:
        w = p * pl.reciprocal(denom, approx=True)            # EUP slot (~free)
    else:
        w = p / denom

    # weighted_sum[b, d] = sum_s w[b, s] * v[b, s, d]
    # Batched MXU contraction over S, f32 accumulation; v stays in its native
    # dtype (bf16-in / f32-accumulate).  See header comment for why the
    # (TB,1,S)x(TB,S,D) form is used rather than a rank-2-lhs dot_general.
    out = jnp.einsum('bqs,bsd->bqd', w.astype(v.dtype)[:, None, :], v,
                     preferred_element_type=jnp.float32)[:, 0, :]   # (TB, D)

    # Lane-dense store: pad to the 128-multiple output slab only when needed
    # (trace-time branch; no per-step work when D is already lane-dense).
    tb, d = out.shape
    dp = o_ref.shape[-1]
    if dp != d:
        out = jnp.concatenate(
            [out, jnp.zeros((tb, dp - d), jnp.float32)], axis=-1)
    o_ref[...] = out.astype(o_ref.dtype)


def _vmem_capacity_bytes():
    # Generation-aware VMEM capacity (v5e/v6e: 128 MiB, v7x: 64 MiB per TC).
    try:
        info = pltpu.get_tpu_info()
        for name in ("vmem_capacity_bytes", "vmem_size_bytes", "vmem_bytes"):
            cap = int(getattr(info, name, 0) or 0)
            if cap > 0:
                return cap
    except Exception:
        pass
    return 64 << 20            # conservative fallback (v7x per-TensorCore size)


def _pick_batch_tile(B, S, D, Dp, itemsize, vmem_cap):
    """Pick the batch tile TB and the (possibly padded) batch extent."""
    # bf16 packs two rows per sublane -> keep TB a multiple of 16 for
    # sub-32-bit dtypes so the (TB, Dp) writeback avoids packed partial stores.
    row_mult = 16 if itemsize < 4 else 8

    if B <= row_mult:
        # Tiny batch: one full-array tile (block dims == array dims satisfies
        # the (8, 128) rule).
        return B, B

    # Per-batch-row VMEM cost of one pipeline stage: double-buffered v tile,
    # double-buffered output slab, plus f32 intermediates (scores/p/w, out).
    bytes_per_row = (2 * S * D * itemsize + 2 * Dp * itemsize
                     + 4 * (3 * S + D + Dp))
    # Spend a fraction of physical VMEM on the pipeline so spills are avoided
    # even on v7x's 64 MiB; large tiles amortize the ~0.35 us per-grid-step
    # overhead and keep the DMA engine at the HBM roofline.
    budget = max(8 << 20, min(int(vmem_cap * 0.45), 48 << 20))
    tb = max(row_mult, (budget // bytes_per_row) // row_mult * row_mult)

    # Keep >= 2 grid steps so dimension_semantics=("parallel",) can shard
    # batch tiles across both TensorCores on v7x.
    tb = min(tb, max(row_mult, (B // 2) // row_mult * row_mult))
    tb = min(tb, (B // row_mult) * row_mult)
    tb = max(tb, row_mult)

    # Pad the batch to a tile multiple rather than falling back to an
    # oversized whole-array tile (the padded rows are zeros -> finite output).
    b_pad = pl.cdiv(B, tb) * tb
    return tb, b_pad


def attention_forward(v, A, mask, v0, *, approx_reciprocal=True):
    B, S, D = v.shape
    # O(D^2) parameter matvec, shared by every batch tile: do it once here so
    # the kernel never streams A / mask from HBM.
    av0 = (v0 @ (A * mask)).astype(jnp.float32)              # (1, D)

    Dp = ((D + 127) // 128) * 128                            # lane-dense width
    vmem_cap = _vmem_capacity_bytes()
    TB, B_pad = _pick_batch_tile(B, S, D, Dp, v.dtype.itemsize, vmem_cap)
    if B_pad != B:
        v = jnp.pad(v, ((0, B_pad - B), (0, 0), (0, 0)))

    kernel = functools.partial(attention_kernel,
                               approx_reciprocal=approx_reciprocal)

    out_padded = pl.pallas_call(
        kernel,
        out_shape=jax.ShapeDtypeStruct((B_pad, Dp), v.dtype),
        grid=(B_pad // TB,),
        in_specs=[
            pl.BlockSpec((1, D), lambda i: (0, 0)),          # av0: resident
            pl.BlockSpec((TB, S, D), lambda i: (i, 0, 0)),   # v: batch tiles
        ],
        out_specs=pl.BlockSpec((TB, Dp), lambda i: (i, 0)),
        compiler_params=pltpu.CompilerParams(
            dimension_semantics=("parallel",),               # megacore / v7x
            vmem_limit_bytes=min(int(vmem_cap * 3 // 4), 96 << 20)),
    )(av0, v)
    return out_padded[:B, :D]


def make_params(dim, key):
    # Deterministic re-creation of the module's __init__ (synthetic weights).
    theta = jax.random.uniform(key, ()) * 2.0 * jnp.pi
    A = jnp.zeros((dim, dim), jnp.float32)
    A = A.at[0, 2].set(jnp.cos(theta))
    A = A.at[0, 3].set(jnp.sin(theta))
    mask = jnp.zeros((dim, dim), jnp.float32)
    mask = mask.at[0, 2].set(1.0)
    mask = mask.at[0, 3].set(1.0)
    v0 = jnp.zeros((1, dim), jnp.float32)
    v0 = v0.at[0, 0].set(1.0)
    return A, mask, v0


def reference_forward(v, A, mask, v0):
    vf = v.astype(jnp.float32)
    A_masked = A * mask
    Av0 = (v0 @ A_masked)[0]                                 # (D,)
    scores = jnp.einsum('bsd,d->bs', vf, Av0)
    w = jax.nn.softmax(scores, axis=-1)
    return jnp.einsum('bs,bsd->bd', w, vf)


if __name__ == "__main__":
    key = jax.random.PRNGKey(0)
    k_theta, k_v, k_v2 = jax.random.split(key, 3)

    # Primary check: small f32 shapes consistent with the module's forward.
    B, S, D = 2, 8, 32
    A, mask, v0 = make_params(D, k_theta)
    v = jax.random.normal(k_v, (B, S, D), jnp.float32)

    out = attention_forward(v, A, mask, v0)
    out = jax.block_until_ready(out)
    ref = reference_forward(v, A, mask, v0)
    # Tolerance accommodates the EUP approximate reciprocal in the softmax.
    np.testing.assert_allclose(np.asarray(out), np.asarray(ref),
                               rtol=2e-3, atol=2e-3)

    # Secondary check: bf16 streaming path with an awkward batch size,
    # exercising the multi-step grid, batch padding and packed-row writeback.
    B2 = 33
    v2 = jax.random.normal(k_v2, (B2, S, D), jnp.float32).astype(jnp.bfloat16)
    out2 = attention_forward(v2, A, mask, v0)
    out2 = jax.block_until_ready(out2)
    ref2 = reference_forward(v2, A, mask, v0)
    np.testing.assert_allclose(np.asarray(out2, dtype=np.float32),
                               np.asarray(ref2), rtol=4e-2, atol=4e-2)

    print("KERNEL_OK")
</pallas_src>

<mosaic_0001>
module attributes {stable_mosaic.version = 11 : i64} {
  func.func @attention_kernel(%arg0: i32, %arg1: memref<1x32xf32, #tpu.memory_space<vmem>>, %arg2: memref<2x8x32xf32, #tpu.memory_space<vmem>>, %arg3: memref<2x128xf32, #tpu.memory_space<vmem>>) attributes {dimension_semantics = [#tpu.dimension_semantics<parallel>], iteration_bounds = array<i64: 1>, scalar_prefetch = 0 : i64, scratch_operands = 0 : i64, tpu.core_type = #tpu.core_type<tc>, window_params = [{pipeline_mode = #tpu.pipeline_mode<synchronous>, transform_indices = @transform_0, window_bounds = array<i64: 1, 32>}, {transform_indices = @transform_1, window_bounds = array<i64: 2, 8, 32>}, {transform_indices = @transform_2, window_bounds = array<i64: 2, 128>}]} {
    %c0 = arith.constant 0 : index
    %c0_0 = arith.constant 0 : index
    %c0_1 = arith.constant 0 : index
    %0 = vector.load %arg2[%c0, %c0_0, %c0_1] : memref<2x8x32xf32, #tpu.memory_space<vmem>>, vector<2x8x32xf32>
    %c0_2 = arith.constant 0 : index
    %c0_3 = arith.constant 0 : index
    %1 = vector.load %arg1[%c0_2, %c0_3] : memref<1x32xf32, #tpu.memory_space<vmem>>, vector<1x32xf32>
    %2 = vector.shape_cast %1 : vector<1x32xf32> to vector<1x1x32xf32>
    %3 = vector.broadcast %2 : vector<1x1x32xf32> to vector<2x8x32xf32>
    %4 = arith.mulf %0, %3 : vector<2x8x32xf32>
    %cst = arith.constant dense<0.000000e+00> : vector<2x8xf32>
    %5 = vector.multi_reduction <add>, %4, %cst [2] : vector<2x8x32xf32> to vector<2x8xf32>
    %cst_4 = arith.constant dense<0xFF800000> : vector<2xf32>
    %6 = vector.multi_reduction <maximumf>, %5, %cst_4 [1] : vector<2x8xf32> to vector<2xf32>
    %7 = vector.shape_cast %6 : vector<2xf32> to vector<2x1xf32>
    %8 = vector.broadcast %7 : vector<2x1xf32> to vector<2x8xf32>
    %9 = arith.subf %5, %8 : vector<2x8xf32>
    %10 = math.exp %9 : vector<2x8xf32>
    %cst_5 = arith.constant dense<0.000000e+00> : vector<2xf32>
    %11 = vector.multi_reduction <add>, %10, %cst_5 [1] : vector<2x8xf32> to vector<2xf32>
    %12 = vector.shape_cast %11 : vector<2xf32> to vector<2x1xf32>
    %13 = tpu.reciprocal %12 {approx = true} : vector<2x1xf32> -> vector<2x1xf32>
    %14 = vector.broadcast %13 : vector<2x1xf32> to vector<2x8xf32>
    %15 = arith.mulf %10, %14 : vector<2x8xf32>
    %16 = vector.shape_cast %15 : vector<2x8xf32> to vector<2x1x8xf32>
    "tpu.trace_start"() <{level = 10 : i32, message = "bqs,bsd->bqd"}> : () -> ()
    %cst_6 = arith.constant dense<0.000000e+00> : vector<2x1x32xf32>
    %17 = tpu.matmul %16, %0, %cst_6 {dimension_numbers = #tpu.dot_dimension_numbers<[2], [1], [1], [2], [0, 0, 0, 1, 1, 2], [0], [0]>} : vector<2x1x8xf32>, vector<2x8x32xf32>, vector<2x1x32xf32> -> vector<2x1x32xf32>
    "tpu.trace_stop"() : () -> ()
    %18 = vector.shape_cast %17 : vector<2x1x32xf32> to vector<2x32xf32>
    %cst_7 = arith.constant 0.000000e+00 : f32
    %19 = vector.broadcast %cst_7 : f32 to vector<2x96xf32>
    %20 = tpu.concatenate %18, %19 in 1 : vector<2x32xf32>, vector<2x96xf32> -> vector<2x128xf32>
    %c0_8 = arith.constant 0 : index
    %c0_9 = arith.constant 0 : index
    %21 = vector.load %arg3[%c0_8, %c0_9] : memref<2x128xf32, #tpu.memory_space<vmem>>, vector<2x128xf32>
    tpu.vector_store %arg3[%c0_8, %c0_9], %20 {strides = array<i32>} : memref<2x128xf32, #tpu.memory_space<vmem>>, vector<2x128xf32>,
    return
  }
  func.func @transform_0(%arg0: i32) -> (i32, i32) {
    %c0_i32 = arith.constant 0 : i32
    %c0_i32_0 = arith.constant 0 : i32
    %c0_i32_1 = arith.constant 0 : i32
    return %c0_i32, %c0_i32_0 : i32, i32
  }
  func.func @transform_1(%arg0: i32) -> (i32, i32, i32) {
    %c0_i32 = arith.constant 0 : i32
    %c0_i32_0 = arith.constant 0 : i32
    %c0_i32_1 = arith.constant 0 : i32
    return %arg0, %c0_i32, %c0_i32_0 : i32, i32, i32
  }
  func.func @transform_2(%arg0: i32) -> (i32, i32) {
    %c0_i32 = arith.constant 0 : i32
    %c0_i32_0 = arith.constant 0 : i32
    return %arg0, %c0_i32 : i32, i32
  }
}

</mosaic_0001>

<bundles_post_ra>
// kernel: tpu_custom_call.1
= control target key start
LH: loop header
LB: loop body
LE: loop exit
PB: predicated region body
PF: predicated region fallthrough
CT: control target
= control target key end

     0   :  { %7 = vsyncpa [#allocation3], 0  ;;  %s318_s0 = inlined_call_operand.hbm [shape: f32[1,32], index: 0, kind: input, shape index: {}]   ;;  %s319_s1 = inlined_call_operand.hbm [shape: f32[2,8,32], index: 1, kind: input, shape index: {}]   ;;  %s320_s2 = inlined_call_operand.hbm [shape: f32[2,128], index: 2, kind: output, shape index: {}]  }
   0x1   :  { %8 = vsyncpa [#allocation6], 0 }
   0x2   :  { %9 = vsyncpa [#allocation4], 0  ;;  %s15_s11 = sshll.u32 %s318_s0, 4  ;;  %s280_s12 = smov [#allocation2]   ;;  %s16_s11 = int_to_ptr.hbm [resolvable:$true] %s15_s11 }
   0x3   :  { %s17_s13 = sshll.u32 %s280_s12, 4  ;;  %s25_s16 = sshll.u32 %s319_s1, 4  ;;  %s18_s13 = int_to_ptr.vmem [resolvable:$true] %s17_s13  ;;  %s26_s16 = int_to_ptr.hbm [resolvable:$true] %s25_s16 }
   0x4   :  { %20 = dma.hbm_to_vmem [thread:$0]  %s16_s11, 16, %s18_s13, [#allocation3]  }
   0x5   :  { %s281_s17 = smov [#allocation5]   ;;  %s282_s19 = smov 128  }
   0x6   :  { %s27_s18 = sshll.u32 %s281_s17, 4  ;;  %s283_s20 = smov 8   ;;  %s28_s18 = int_to_ptr.vmem [resolvable:$true] %s27_s18 }
   0x7   :  { %33 = dma.hbm_to_vmem [thread:$0]  %s26_s16, 256, %s28_s18, [#allocation6], %s282_s19, %s282_s19, %s283_s20  }
   0x8   :  { %274 = dma.done.wait [#allocation3], 16  }
   0x9   :  { %275 = vsyncadd [#allocation3], 4294967280 }
   0xa   :  { %276 = dma.done.wait [#allocation6], 256  }
   0xb   :  { %277 = vsyncadd [#allocation6], 4294967040  ;;  %v42_v0 = vld [vmem:[#allocation5] sm:$0xff]  ;;  %v195_v1 = vld [vmem:[#allocation2] ss:$0 sm:$0xff]  ;;  %vm50_vm0 = vcmask 261120   ;;  %v59_v8 = vlaneseq }
   0xc   :  { %v43_v2 = vld [vmem:[#allocation5 + $0x8] sm:$0xff]  ;;  %127 = vmatpush.msra.mxu0 %v42_v0  ;;  %v48_v3 = vmul.f32 %v195_v1, %v42_v0  ;;  %vm63_vm1 = vcmask 1041409   ;;  %vm66_vm2 = vcmask 58368   ;;  %v284_v15 = vmov 0   ;;  %s285_s0 = smov [#allocation7]   ;;  %s173_s23 = sshll.u32 %s320_s2, 4  ;;  %s174_s23 = int_to_ptr.hbm [resolvable:$true] %s173_s23 }
   0xd   :  { %154 = vmatpush.msra.mxu1 %v43_v2  ;;  %v49_v5 = vmul.f32 %v195_v1, %v43_v2  ;;  %v60_v9 = vand.u32 127, %v59_v8  ;;  %193 = vset.pattern.permute.xlu2 %v284_v15  ;;  %vm109_vm3 = vcmask 64512   ;;  %s171_s1 = sshll.u32 %s285_s0, 4  ;;  %s172_s1 = int_to_ptr.vmem [resolvable:$true] %s171_s1 }
   0xe   :  { %v51_v4 = vsel %vm50_vm0, %v48_v3, 0.0  ;;  %192 = vset.pattern.permute.xlu1 %v284_v15  ;;  %194 = vset.pattern.permute.xlu0 %v284_v15 }
   0xf   :  { %52 = vadd.xlane.f32.xlu0 %v51_v4  ;;  %v54_v6 = vsel %vm50_vm0, %v49_v5, 0.0 }
  0x17   :  { %55 = vadd.xlane.f32.xlu0 %v54_v6 }
  0x82   :  { %v53_v7 = vpop.xlane.xlu0 %52 }
  0x83   :  { %v61_v11 = vperm.slane %v53_v7, %v60_v9 }
  0x8a   :  { %v56_v10 = vpop.xlane.xlu0 %55 }
  0x8b   :  { %v62_v12 = vperm.slane %v56_v10, %v60_v9 }
  0x8d   :  { %v64_v13 = vsel %vm63_vm1, %v62_v12, %v61_v11 }
  0x8e   :  { %v67_v14 = vsel %vm66_vm2, %v64_v13, -inf }
  0x8f   :  { %68 = vmax.xlane.f32.xlu1 %v67_v14 }
 0x102   :  { %v69_v16 = vpop.xlane.xlu1 %68 }
 0x103   :  { %v71_v17 = vperm.slane %v69_v16, 0  ;;  %v72_v18 = vperm.slane %v69_v16, 1 }
 0x105   :  { %v75_v19 = vsub.f32 %v53_v7, %v71_v17  ;;  %v76_v20 = vsub.f32 %v56_v10, %v72_v18 }
 0x107   :  { %v77_v21 = vmul.f32 1.442695, %v75_v19  ;;  %v79_v22 = vmul.f32 1.442695, %v76_v20 }
 0x109   :  { %196 = vpow2.f32 %v77_v21 }
 0x10a   :  { %198 = vpow2.f32 %v79_v22 }
 0x10f   :  { %v197_v23 = vpop.eup %196 }
 0x110   :  { %v199_v24 = vpop.eup %198  ;;  %84 = vperm.xlu1 %192, %v197_v23  }
 0x111   :  { %87 = vperm.xlu2 %193, %v199_v24  }
 0x16b   :  { %v88_v25 = vpop.permute.xlu2 %87 }
 0x16c   :  { %v90_v27 = vperm.slane %v88_v25, %v60_v9 }
 0x182   :  { %v85_v26 = vpop.permute.xlu1 %84 }
 0x183   :  { %v89_v28 = vperm.slane %v85_v26, %v60_v9 }
 0x185   :  { %v91_v29 = vsel %vm63_vm1, %v90_v27, %v89_v28 }
 0x186   :  { %v93_v30 = vsel %vm66_vm2, %v91_v29, 0.0 }
 0x187   :  { %94 = vadd.xlane.f32.xlu2 %v93_v30 }
 0x1fa   :  { %v95_v31 = vpop.xlane.xlu2 %94 }
 0x1fb   :  { %200 = vrcp.f32 %v95_v31 }
 0x201   :  { %v201_v32 = vpop.eup %200 }
 0x202   :  { %v99_v33 = vperm.slane %v201_v32, 1  ;;  %v98_v34 = vperm.slane %v201_v32, 0 }
 0x204   :  { %v103_v35 = vmul.f32 %v199_v24, %v99_v33  ;;  %v102_v36 = vmul.f32 %v197_v23, %v98_v34 }
 0x206   :  { %134 = vperm.xlu0 %194, %v103_v35   ;;  %106 = vperm.xlu1 %192, %v102_v36  }
 0x278   :  { %v135_v37 = vpop.permute.xlu0 %134  ;;  %v107_v38 = vpop.permute.xlu1 %106 }
 0x279   :  { %v136_v39 = vperm.slane %v135_v37, %v60_v9  ;;  %v108_v40 = vperm.slane %v107_v38, %v60_v9 }
 0x27b   :  { %184 = vmatmul.msk.f32.vlgmr.msra.gmra.mxu0 %vm109_vm3, %v108_v40  ;;  %185 = vmatmul.msk.f32.vlgmr.msra.gmra.mxu1 %vm109_vm3, %v136_v39 }
 0x2f8   :  { %v156_v41 = vpop.f32.mrf.mxu1  ;;  %v129_v43 = vpop.f32.mrf.mxu0 }
 0x2f9   :  { %v161_v42 = vrot.slane %v156_v41, 7 }
 0x2fb   :  { %v162_v44 = vsel %vm63_vm1, %v161_v42, %v129_v43 }
 0x2fc   :  { %v164_v45 = vsel %vm50_vm0, %v162_v44, 0.0 }
 0x2fd   :  { %165 = vst [vmem:[#allocation7] sm:$0x3] %v164_v45 }
 0x2fe   :  { %176 = dma.vmem_to_hbm [thread:$0]  %s172_s1, 32, %s174_s23, [#allocation4]  }
 0x2ff   :  { %278 = dma.done.wait [#allocation4], 32  }
 0x300   :  { %279 = vsyncadd [#allocation4], 4294967264 }
 0x301   :  { %181 = vsyncpa [#allocation3], 1 }
 0x302   :  { %182 = vsyncpa [#allocation6], 1 }
 0x303   :  { %183 = vsyncpa [#allocation4], 1 }

</bundles_post_ra>
